<compile_context>
chip_gen: v6e
topology: v6e:2x2x1
jax: 0.10.0
libtpu: 0.0.40
codegen_flags: <defaults>
</compile_context>

<pallas_src>
import jax
import jax.numpy as jnp
from jax.experimental import pallas as pl
from jax.experimental.pallas import tpu as pltpu

LANE = 128


def _round_up(a, b):
    return ((a + b - 1) // b) * b


def _mlp_kernel(x_ref, w1_ref, b1_ref, w2_ref, b2_ref, o_ref):
    # fc1 (bf16 x bf16 -> f32 accum on MXU)
    h = jnp.dot(x_ref[...], w1_ref[...], preferred_element_type=jnp.float32)
    h = jnp.maximum(h + b1_ref[...], 0.0)            # bias + ReLU in f32
    # dropout (p=0.2) -> identity in eval mode
    h = h.astype(jnp.bfloat16)                       # keep second matmul on bf16 MXU path
    # fc2
    out = jnp.dot(h, w2_ref[...], preferred_element_type=jnp.float32)
    o_ref[...] = (out + b2_ref[...]).astype(o_ref.dtype)


def node_classification_forward(x, w1, b1, w2, b2, *, tm=1024):
    """x: [N, dim_in] f32; w1: [dim_in, dim_hid]; b1: [dim_hid];
    w2: [dim_hid, num_class]; b2: [num_class]  ->  [N, num_class] f32.

    Weights are pre-transposed ([in, out]) relative to torch.nn.Linear.weight.
    """
    N, dim_in = x.shape
    dim_hid = w1.shape[1]
    num_class = w2.shape[1]

    # --- pad feature dims to the 128-lane width (zero padding keeps math exact) ---
    dim_in_p = _round_up(dim_in, LANE)
    dim_hid_p = _round_up(dim_hid, LANE)
    num_class_p = _round_up(num_class, LANE)

    # --- row tiling: large tile for bandwidth, shrink for tiny N, pad ragged tail ---
    tm = max(8, min(tm, _round_up(N, 8)))
    n_pad = _round_up(N, tm)
    grid = (n_pad // tm,)

    # --- pad + cast inputs at the pallas_call boundary ---
    x_p = jnp.zeros((n_pad, dim_in_p), jnp.bfloat16).at[:N, :dim_in].set(
        x.astype(jnp.bfloat16))
    w1_p = jnp.zeros((dim_in_p, dim_hid_p), jnp.bfloat16).at[:dim_in, :dim_hid].set(
        w1.astype(jnp.bfloat16))
    w2_p = jnp.zeros((dim_hid_p, num_class_p), jnp.bfloat16).at[:dim_hid, :num_class].set(
        w2.astype(jnp.bfloat16))
    b1_p = jnp.zeros((1, dim_hid_p), jnp.float32).at[0, :dim_hid].set(
        b1.astype(jnp.float32))
    b2_p = jnp.zeros((1, num_class_p), jnp.float32).at[0, :num_class].set(
        b2.astype(jnp.float32))

    out_p = pl.pallas_call(
        _mlp_kernel,
        out_shape=jax.ShapeDtypeStruct((n_pad, num_class_p), jnp.float32),
        grid_spec=pltpu.PrefetchScalarGridSpec(
            num_scalar_prefetch=0,
            grid=grid,
            in_specs=[
                pl.BlockSpec((tm, dim_in_p), lambda i: (i, 0)),          # x tile (streamed)
                pl.BlockSpec((dim_in_p, dim_hid_p), lambda i: (0, 0)),   # w1 (resident)
                pl.BlockSpec((1, dim_hid_p), lambda i: (0, 0)),          # b1
                pl.BlockSpec((dim_hid_p, num_class_p), lambda i: (0, 0)),# w2 (resident)
                pl.BlockSpec((1, num_class_p), lambda i: (0, 0)),        # b2
            ],
            out_specs=pl.BlockSpec((tm, num_class_p), lambda i: (i, 0)), # lane-dense store
        ),
        compiler_params=pltpu.CompilerParams(
            dimension_semantics=("parallel",),   # grid steps shard across TCs (v7x megacore)
        ),
    )(x_p, w1_p, b1_p, w2_p, b2_p)

    return out_p[:N, :num_class]


def reference_forward_f32(x, w1, b1, w2, b2):
    h = jnp.maximum(x @ w1 + b1, 0.0)
    return h @ w2 + b2


def reference_forward_bf16(x, w1, b1, w2, b2):
    # Mirrors the kernel's precision policy: bf16 operands, f32 accumulation.
    f32 = jnp.float32
    xb = x.astype(jnp.bfloat16).astype(f32)
    w1b = w1.astype(jnp.bfloat16).astype(f32)
    w2b = w2.astype(jnp.bfloat16).astype(f32)
    h = jnp.maximum(xb @ w1b + b1, 0.0)
    hb = h.astype(jnp.bfloat16).astype(f32)
    return hb @ w2b + b2


if __name__ == "__main__":
    dim_in, dim_hid, num_class = 32, 64, 8

    key = jax.random.PRNGKey(0)
    k1, k2, k3, k4, kx1, kx2 = jax.random.split(key, 6)

    # Deterministic "PyTorch-like" init (uniform +/- 1/sqrt(fan_in)), pre-transposed.
    lim1 = 1.0 / (dim_in ** 0.5)
    w1 = jax.random.uniform(k1, (dim_in, dim_hid), jnp.float32, -lim1, lim1)
    b1 = jax.random.uniform(k2, (dim_hid,), jnp.float32, -lim1, lim1)
    lim2 = 1.0 / (dim_hid ** 0.5)
    w2 = jax.random.uniform(k3, (dim_hid, num_class), jnp.float32, -lim2, lim2)
    b2 = jax.random.uniform(k4, (num_class,), jnp.float32, -lim2, lim2)

    # Case 1: ragged node count (exercises row padding / tail handling).
    x1 = jax.random.normal(kx1, (300, dim_in), dtype=jnp.float32)
    out1 = jax.block_until_ready(node_classification_forward(x1, w1, b1, w2, b2))
    assert out1.shape == (300, num_class)
    ref1 = reference_forward_bf16(x1, w1, b1, w2, b2)
    assert jnp.allclose(out1, ref1, atol=2e-3, rtol=2e-3), "mismatch vs bf16 reference (case 1)"
    assert jnp.allclose(out1, reference_forward_f32(x1, w1, b1, w2, b2), atol=5e-2), \
        "mismatch vs f32 reference (case 1)"

    # Case 2: multi-tile grid (2 steps at tm=1024 -> both TensorCores on v7x).
    x2 = jax.random.normal(kx2, (2048, dim_in), dtype=jnp.float32)
    out2 = jax.block_until_ready(node_classification_forward(x2, w1, b1, w2, b2, tm=1024))
    assert out2.shape == (2048, num_class)
    ref2 = reference_forward_bf16(x2, w1, b1, w2, b2)
    assert jnp.allclose(out2, ref2, atol=2e-3, rtol=2e-3), "mismatch vs bf16 reference (case 2)"
    assert jnp.allclose(out2, reference_forward_f32(x2, w1, b1, w2, b2), atol=5e-2), \
        "mismatch vs f32 reference (case 2)"

    print("KERNEL_OK")
</pallas_src>

<mosaic_0001>
module attributes {stable_mosaic.version = 11 : i64} {
  func.func @_mlp_kernel(%arg0: i32, %arg1: memref<304x128xbf16, #tpu.memory_space<vmem>>, %arg2: memref<128x128xbf16, #tpu.memory_space<vmem>>, %arg3: memref<1x128xf32, #tpu.memory_space<vmem>>, %arg4: memref<128x128xbf16, #tpu.memory_space<vmem>>, %arg5: memref<1x128xf32, #tpu.memory_space<vmem>>, %arg6: memref<304x128xf32, #tpu.memory_space<vmem>>) attributes {dimension_semantics = [#tpu.dimension_semantics<parallel>], iteration_bounds = array<i64: 1>, scalar_prefetch = 0 : i64, scratch_operands = 0 : i64, tpu.core_type = #tpu.core_type<tc>, window_params = [{transform_indices = @transform_0, window_bounds = array<i64: 304, 128>}, {pipeline_mode = #tpu.pipeline_mode<synchronous>, transform_indices = @transform_1, window_bounds = array<i64: 128, 128>}, {pipeline_mode = #tpu.pipeline_mode<synchronous>, transform_indices = @transform_2, window_bounds = array<i64: 1, 128>}, {pipeline_mode = #tpu.pipeline_mode<synchronous>, transform_indices = @transform_3, window_bounds = array<i64: 128, 128>}, {pipeline_mode = #tpu.pipeline_mode<synchronous>, transform_indices = @transform_4, window_bounds = array<i64: 1, 128>}, {transform_indices = @transform_5, window_bounds = array<i64: 304, 128>}]} {
    %c0 = arith.constant 0 : index
    %c0_0 = arith.constant 0 : index
    %0 = vector.load %arg1[%c0, %c0_0] : memref<304x128xbf16, #tpu.memory_space<vmem>>, vector<304x128xbf16>
    %c0_1 = arith.constant 0 : index
    %c0_2 = arith.constant 0 : index
    %1 = vector.load %arg2[%c0_1, %c0_2] : memref<128x128xbf16, #tpu.memory_space<vmem>>, vector<128x128xbf16>
    %cst = arith.constant dense<0.000000e+00> : vector<304x128xf32>
    %2 = tpu.matmul %0, %1, %cst {dimension_numbers = #tpu.dot_dimension_numbers<[1], [0], [0], [1], [0, 0, 1, 1], [], []>} : vector<304x128xbf16>, vector<128x128xbf16>, vector<304x128xf32> -> vector<304x128xf32>
    %c0_3 = arith.constant 0 : index
    %c0_4 = arith.constant 0 : index
    %3 = vector.load %arg3[%c0_3, %c0_4] : memref<1x128xf32, #tpu.memory_space<vmem>>, vector<1x128xf32>
    %4 = vector.broadcast %3 : vector<1x128xf32> to vector<304x128xf32>
    %5 = arith.addf %2, %4 : vector<304x128xf32>
    %cst_5 = arith.constant 0.000000e+00 : f32
    %6 = vector.broadcast %cst_5 : f32 to vector<304x128xf32>
    %7 = arith.maximumf %5, %6 : vector<304x128xf32>
    %8 = arith.truncf %7 : vector<304x128xf32> to vector<304x128xbf16>
    %c0_6 = arith.constant 0 : index
    %c0_7 = arith.constant 0 : index
    %9 = vector.load %arg4[%c0_6, %c0_7] : memref<128x128xbf16, #tpu.memory_space<vmem>>, vector<128x128xbf16>
    %cst_8 = arith.constant dense<0.000000e+00> : vector<304x128xf32>
    %10 = tpu.matmul %8, %9, %cst_8 {dimension_numbers = #tpu.dot_dimension_numbers<[1], [0], [0], [1], [0, 0, 1, 1], [], []>} : vector<304x128xbf16>, vector<128x128xbf16>, vector<304x128xf32> -> vector<304x128xf32>
    %c0_9 = arith.constant 0 : index
    %c0_10 = arith.constant 0 : index
    %11 = vector.load %arg5[%c0_9, %c0_10] : memref<1x128xf32, #tpu.memory_space<vmem>>, vector<1x128xf32>
    %12 = vector.broadcast %11 : vector<1x128xf32> to vector<304x128xf32>
    %13 = arith.addf %10, %12 : vector<304x128xf32>
    %c0_11 = arith.constant 0 : index
    %c0_12 = arith.constant 0 : index
    %14 = vector.load %arg6[%c0_11, %c0_12] : memref<304x128xf32, #tpu.memory_space<vmem>>, vector<304x128xf32>
    tpu.vector_store %arg6[%c0_11, %c0_12], %13 {strides = array<i32>} : memref<304x128xf32, #tpu.memory_space<vmem>>, vector<304x128xf32>,
    return
  }
  func.func @transform_0(%arg0: i32) -> (i32, i32) {
    %c0_i32 = arith.constant 0 : i32
    %c0_i32_0 = arith.constant 0 : i32
    return %arg0, %c0_i32 : i32, i32
  }
  func.func @transform_1(%arg0: i32) -> (i32, i32) {
    %c0_i32 = arith.constant 0 : i32
    %c0_i32_0 = arith.constant 0 : i32
    %c0_i32_1 = arith.constant 0 : i32
    return %c0_i32, %c0_i32_0 : i32, i32
  }
  func.func @transform_2(%arg0: i32) -> (i32, i32) {
    %c0_i32 = arith.constant 0 : i32
    %c0_i32_0 = arith.constant 0 : i32
    %c0_i32_1 = arith.constant 0 : i32
    return %c0_i32, %c0_i32_0 : i32, i32
  }
  func.func @transform_3(%arg0: i32) -> (i32, i32) {
    %c0_i32 = arith.constant 0 : i32
    %c0_i32_0 = arith.constant 0 : i32
    %c0_i32_1 = arith.constant 0 : i32
    return %c0_i32, %c0_i32_0 : i32, i32
  }
  func.func @transform_4(%arg0: i32) -> (i32, i32) {
    %c0_i32 = arith.constant 0 : i32
    %c0_i32_0 = arith.constant 0 : i32
    %c0_i32_1 = arith.constant 0 : i32
    return %c0_i32, %c0_i32_0 : i32, i32
  }
  func.func @transform_5(%arg0: i32) -> (i32, i32) {
    %c0_i32 = arith.constant 0 : i32
    %c0_i32_0 = arith.constant 0 : i32
    return %arg0, %c0_i32 : i32, i32
  }
}

</mosaic_0001>

<bundles_post_ra>
// kernel: tpu_custom_call.1
= control target key start
LH: loop header
LB: loop body
LE: loop exit
PB: predicated region body
PF: predicated region fallthrough
CT: control target
= control target key end

     0   :  { %10 = vsyncpa [#allocation3], 0  ;;  %s1476_s0 = inlined_call_operand.hbm [shape: bf16[304,128], index: 0, kind: input, shape index: {}]   ;;  %s1477_s1 = inlined_call_operand.hbm [shape: bf16[128,128], index: 1, kind: input, shape index: {}]   ;;  %s1478_s2 = inlined_call_operand.vmem [shape: f32[1,128], index: 2, kind: input, shape index: {}]   ;;  %s1479_s3 = inlined_call_operand.hbm [shape: bf16[128,128], index: 3, kind: input, shape index: {}]   ;;  %s1480_s4 = inlined_call_operand.vmem [shape: f32[1,128], index: 4, kind: input, shape index: {}]   ;;  %s1481_s5 = inlined_call_operand.hbm [shape: f32[304,128], index: 5, kind: output, shape index: {}]  }
   0x1   :  { %11 = vsyncpa [#allocation6], 0 }
   0x2   :  { %12 = vsyncpa [#allocation4], 0  ;;  %s1246_s18 = smov [#allocation5]   ;;  %s1247_s20 = smov [#allocation2]  }
   0x3   :  { %s30_s19 = sshll.u32 %s1246_s18, 4  ;;  %s18_s21 = sshll.u32 %s1247_s20, 4  ;;  %s31_s19 = int_to_ptr.vmem [resolvable:$true] %s30_s19  ;;  %s19_s21 = int_to_ptr.vmem [resolvable:$true] %s18_s21 }
   0x4   :  { %s1168_s22 = scalar_lea.vmem %s31_s19, 1024  ;;  %p1173_p1 = scmp.lt.s32.totalorder %s31_s19, %s31_s19 }
   0x5   :  { %p1169_p0 = scmp.ne.s32.totalorder %s31_s19, %s1168_s22  ;;  %p1174_p2 = scmp.lt.s32.totalorder %s1168_s22, %s1168_s22 }
   0x7   :  { %p1175_p3 = por %p1174_p2, %p1173_p1 }
   0x9   :  { %p1176_p4 = pnand %p1175_p3, %p1169_p0 }
   0xb   :  { %1179 = shalt.err (!%p1176_p4)
}
   0xc   :  { %s1248_s23 = smov 64   ;;  %s1249_s24 = smov 4  }
   0xd   :  { %36 = dma.hbm_to_vmem [thread:$0]  %s1477_s1, 1024, %s31_s19, [#allocation6], %s1248_s23, %s1248_s23, %s1249_s24  }
   0xe   :  { %s1188_s27 = scalar_lea.vmem %s19_s21, 2432  ;;  %p1193_p6 = scmp.lt.s32.totalorder %s19_s21, %s19_s21 }
   0xf   :  { %p1189_p5 = scmp.ne.s32.totalorder %s19_s21, %s1188_s27  ;;  %p1194_p7 = scmp.lt.s32.totalorder %s1188_s27, %s1188_s27 }
  0x11   :  { %p1195_p8 = por %p1194_p7, %p1193_p6 }
  0x13   :  { %p1196_p9 = pnand %p1195_p8, %p1189_p5 }
  0x15   :  { %1199 = shalt.err (!%p1196_p9)
}
  0x16   :  { %24 = dma.hbm_to_vmem [thread:$0]  %s1476_s0, 2432, %s19_s21, [#allocation3], %s1248_s23, %s1248_s23, %s1249_s24  }
  0x17   :  { %s1250_s30 = smov [#allocation7]  }
  0x18   :  { %s44_s6 = sshll.u32 %s1250_s30, 4  ;;  %s45_s6 = int_to_ptr.vmem [resolvable:$true] %s44_s6 }
  0x19   :  { %s1208_s7 = scalar_lea.vmem %s45_s6, 1024  ;;  %p1213_p11 = scmp.lt.s32.totalorder %s45_s6, %s45_s6 }
  0x1a   :  { %p1209_p10 = scmp.ne.s32.totalorder %s45_s6, %s1208_s7  ;;  %p1214_p12 = scmp.lt.s32.totalorder %s1208_s7, %s1208_s7 }
  0x1c   :  { %p1215_p13 = por %p1214_p12, %p1213_p11 }
  0x1e   :  { %p1216_p0 = pnand %p1215_p13, %p1209_p10 }
  0x20   :  { %1219 = shalt.err (!%p1216_p0)
}
  0x21   :  { %50 = dma.hbm_to_vmem [thread:$0]  %s1479_s3, 1024, %s45_s6, [#allocation6], %s1248_s23, %s1248_s23, %s1249_s24  }
  0x22   :  { %1240 = dma.done.wait [#allocation3], 2432  }
  0x23   :  { %1241 = vsyncadd [#allocation3], 4294964864 }
  0x24   :  { %1242 = dma.done.wait [#allocation6], 2048  }
  0x25   :  { %1243 = vsyncadd [#allocation6], 4294965248  ;;  %v1251_v0 = vmov 0.0   ;;  %vm1252_vm0 = vmmov 0   ;;  %v1125_v1 = vld [vmem:[#allocation5 + $0x38] sm:$0xff]   ;;  %v1126_v2 = vld [vmem:[#allocation5 + $0x30] sm:$0xff]  }
  0x26   :  { %931 = vmatprep.subr.bf16.mxu0 %v1251_v0  ;;  %947 = vmatprep.mubr.msk.bf16.mxu0 %vm1252_vm0, %v1251_v0  ;;  %v1127_v3 = vld [vmem:[#allocation5 + $0x28] sm:$0xff]   ;;  %v1128_v4 = vld [vmem:[#allocation5 + $0x20] sm:$0xff]   ;;  %v1129_v5 = vld [vmem:[#allocation5 + $0x18] sm:$0xff]  }
  0x27   :  { %1023 = vmatprep.subr.bf16.mxu1 %v1251_v0  ;;  %1039 = vmatprep.mubr.msk.bf16.mxu1 %vm1252_vm0, %v1251_v0  ;;  %v1130_v6 = vld [vmem:[#allocation5 + $0x10] sm:$0xff]   ;;  %v1131_v7 = vld [vmem:[#allocation5 + $0x8] sm:$0xff]   ;;  %v1132_v8 = vld [vmem:[#allocation5] sm:$0xff]  }
  0x28   :  { %932 = vmatpush3.bf16.msra.mxu0 %v1125_v1  ;;  %v1133_v9 = vld [vmem:[#allocation2] sm:$0xff]   ;;  %v1134_v10 = vld [vmem:[#allocation2 + $0x8] sm:$0xff]   ;;  %v1135_v11 = vld [vmem:[#allocation2 + $0x10] sm:$0xff]  }
  0x29   :  { %933 = vmatprep.subr.bf16.mxu0 %v1251_v0  ;;  %v1152_v12 = vld [vmem:[#allocation7 + $0x38] sm:$0xff]   ;;  %v1153_v13 = vld [vmem:[#allocation7 + $0x30] sm:$0xff]   ;;  %v1136_v14 = vld [vmem:[#allocation2 + $0x18] sm:$0xff]  }
  0x2a   :  { %1024 = vmatpush3.bf16.msra.mxu1 %v1152_v12  ;;  %v1154_v15 = vld [vmem:[#allocation7 + $0x28] sm:$0xff]   ;;  %v1155_v16 = vld [vmem:[#allocation7 + $0x20] sm:$0xff]   ;;  %v1156_v18 = vld [vmem:[#allocation7 + $0x18] sm:$0xff]  }
  0x2b   :  { %1025 = vmatprep.subr.bf16.mxu1 %v1251_v0  ;;  %v1137_v17 = vld [vmem:[#allocation2 + $0x20] sm:$0xff]   ;;  %v1138_v19 = vld [vmem:[#allocation2 + $0x28] sm:$0xff]   ;;  %v1139_v20 = vld [vmem:[#allocation2 + $0x30] sm:$0xff]  }
  0x2c   :  { %934 = vmatpush3.bf16.msra.mxu0 %v1126_v2  ;;  %v1140_v21 = vld [vmem:[#allocation2 + $0x38] sm:$0xff]   ;;  %v1141_v22 = vld [vmem:[#allocation2 + $0x40] sm:$0xff]   ;;  %v1157_v23 = vld [vmem:[#allocation7 + $0x10] sm:$0xff]  }
  0x2d   :  { %935 = vmatprep.subr.bf16.mxu0 %v1251_v0  ;;  %v1158_v24 = vld [vmem:[#allocation7 + $0x8] sm:$0xff]   ;;  %v1142_v25 = vld [vmem:[#allocation2 + $0x48] sm:$0xff]   ;;  %v1159_v26 = vld [vmem:[#allocation7] sm:$0xff]  }
  0x2e   :  { %1026 = vmatpush3.bf16.msra.mxu1 %v1153_v13  ;;  %v1143_v27 = vld [vmem:[#allocation2 + $0x50] sm:$0xff]   ;;  %v1144_v28 = vld [vmem:[#allocation2 + $0x58] sm:$0xff]   ;;  %v1145_v29 = vld [vmem:[#allocation2 + $0x60] sm:$0xff]  }
  0x2f   :  { %1027 = vmatprep.subr.bf16.mxu1 %v1251_v0  ;;  %v1146_v30 = vld [vmem:[#allocation2 + $0x68] sm:$0xff]   ;;  %v1147_v31 = vld [vmem:[#allocation2 + $0x70] sm:$0xff]   ;;  %v1148_v32 = vld [vmem:[#allocation2 + $0x78] sm:$0xff]  }
  0x30   :  { %936 = vmatpush3.bf16.msra.mxu0 %v1127_v3  ;;  %v1149_v33 = vld [vmem:[#allocation2 + $0x80] sm:$0xff]   ;;  %v1150_v34 = vld [vmem:[#allocation2 + $0x88] sm:$0xff]   ;;  %v1151_v35 = vld [vmem:[#allocation2 + $0x90] sm:$0xff]  }
  0x31   :  { %937 = vmatprep.subr.bf16.mxu0 %v1251_v0  ;;  %v1354_v36 = vld [vmem:[%s1478_s2] ss:$0 sm:$0xff] }
  0x32   :  { %1028 = vmatpush3.bf16.msra.mxu1 %v1154_v15 }
  0x33   :  { %1029 = vmatprep.subr.bf16.mxu1 %v1251_v0 }
  0x34   :  { %938 = vmatpush3.bf16.msra.mxu0 %v1128_v4 }
  0x35   :  { %939 = vmatprep.subr.bf16.mxu0 %v1251_v0 }
  0x36   :  { %1030 = vmatpush3.bf16.msra.mxu1 %v1155_v16 }
  0x37   :  { %1031 = vmatprep.subr.bf16.mxu1 %v1251_v0 }
  0x38   :  { %940 = vmatpush3.bf16.msra.mxu0 %v1129_v5 }
  0x39   :  { %941 = vmatprep.subr.bf16.mxu0 %v1251_v0 }
  0x3a   :  { %1032 = vmatpush3.bf16.msra.mxu1 %v1156_v18 }
  0x3b   :  { %1033 = vmatprep.subr.bf16.mxu1 %v1251_v0 }
  0x3c   :  { %942 = vmatpush3.bf16.msra.mxu0 %v1130_v6 }
  0x3d   :  { %943 = vmatprep.subr.bf16.mxu0 %v1251_v0 }
  0x3e   :  { %1034 = vmatpush3.bf16.msra.mxu1 %v1157_v23 }
  0x3f   :  { %1035 = vmatprep.subr.bf16.mxu1 %v1251_v0 }
  0x40   :  { %944 = vmatpush3.bf16.msra.mxu0 %v1131_v7 }
  0x41   :  { %945 = vmatprep.subr.bf16.mxu0 %v1251_v0 }
  0x42   :  { %1036 = vmatpush3.bf16.msra.mxu1 %v1158_v24 }
  0x43   :  { %1037 = vmatprep.subr.bf16.mxu1 %v1251_v0 }
  0x44   :  { %946 = vmatpush3.bf16.msra.mxu0 %v1132_v8 }
  0x46   :  { %1038 = vmatpush3.bf16.msra.mxu1 %v1159_v26 }
  0x47   :  { %948 = vmatmul.mubr.bf16.vlgmr.msra.gmra.mxu0 %v1133_v9 }
  0x48   :  { %951 = vmatprep.mubr.msk.bf16.mxu0 %vm1252_vm0, %v1251_v0 }
  0x4f   :  { %952 = vmatmul.mubr.bf16.gmra.mxu0 %v1134_v10 }
  0x50   :  { %955 = vmatprep.mubr.msk.bf16.mxu0 %vm1252_vm0, %v1251_v0 }
  0x57   :  { %956 = vmatmul.mubr.bf16.gmra.mxu0 %v1135_v11 }
  0x58   :  { %959 = vmatprep.mubr.msk.bf16.mxu0 %vm1252_vm0, %v1251_v0 }
  0x5f   :  { %960 = vmatmul.mubr.bf16.gmra.mxu0 %v1136_v14 }
  0x60   :  { %963 = vmatprep.mubr.msk.bf16.mxu0 %vm1252_vm0, %v1251_v0 }
  0x67   :  { %964 = vmatmul.mubr.bf16.gmra.mxu0 %v1137_v17 }
  0x68   :  { %967 = vmatprep.mubr.msk.bf16.mxu0 %vm1252_vm0, %v1251_v0 }
  0x6f   :  { %968 = vmatmul.mubr.bf16.gmra.mxu0 %v1138_v19 }
  0x70   :  { %971 = vmatprep.mubr.msk.bf16.mxu0 %vm1252_vm0, %v1251_v0 }
  0x77   :  { %972 = vmatmul.mubr.bf16.gmra.mxu0 %v1139_v20 }
  0x78   :  { %975 = vmatprep.mubr.msk.bf16.mxu0 %vm1252_vm0, %v1251_v0 }
  0x7f   :  { %976 = vmatmul.mubr.bf16.gmra.mxu0 %v1140_v21 }
  0x80   :  { %979 = vmatprep.mubr.msk.bf16.mxu0 %vm1252_vm0, %v1251_v0 }
  0x87   :  { %980 = vmatmul.mubr.bf16.gmra.mxu0 %v1141_v22 }
  0x88   :  { %983 = vmatprep.mubr.msk.bf16.mxu0 %vm1252_vm0, %v1251_v0 }
  0x8f   :  { %984 = vmatmul.mubr.bf16.gmra.mxu0 %v1142_v25 }
  0x90   :  { %987 = vmatprep.mubr.msk.bf16.mxu0 %vm1252_vm0, %v1251_v0 }
  0x97   :  { %988 = vmatmul.mubr.bf16.gmra.mxu0 %v1143_v27 }
  0x98   :  { %991 = vmatprep.mubr.msk.bf16.mxu0 %vm1252_vm0, %v1251_v0 }
  0x9f   :  { %992 = vmatmul.mubr.bf16.gmra.mxu0 %v1144_v28 }
  0xa0   :  { %995 = vmatprep.mubr.msk.bf16.mxu0 %vm1252_vm0, %v1251_v0 }
  0xa7   :  { %996 = vmatmul.mubr.bf16.gmra.mxu0 %v1145_v29 }
  0xa8   :  { %999 = vmatprep.mubr.msk.bf16.mxu0 %vm1252_vm0, %v1251_v0 }
  0xaf   :  { %1000 = vmatmul.mubr.bf16.gmra.mxu0 %v1146_v30 }
  0xb0   :  { %1003 = vmatprep.mubr.msk.bf16.mxu0 %vm1252_vm0, %v1251_v0 }
  0xb7   :  { %1004 = vmatmul.mubr.bf16.gmra.mxu0 %v1147_v31 }
  0xb8   :  { %1007 = vmatprep.mubr.msk.bf16.mxu0 %vm1252_vm0, %v1251_v0 }
  0xbf   :  { %1008 = vmatmul.mubr.bf16.gmra.mxu0 %v1148_v32 }
  0xc0   :  { %1011 = vmatprep.mubr.msk.bf16.mxu0 %vm1252_vm0, %v1251_v0 }
  0xc7   :  { %1012 = vmatmul.mubr.bf16.gmra.mxu0 %v1149_v33 }
  0xc8   :  { %1015 = vmatprep.mubr.msk.bf16.mxu0 %vm1252_vm0, %v1251_v0 }
  0xcf   :  { %1016 = vmatmul.mubr.bf16.gmra.mxu0 %v1150_v34 }
  0xd0   :  { %1019 = vmatprep.mubr.msk.bf16.mxu0 %vm1252_vm0, %v1251_v0 }
  0xd7   :  { %1020 = vmatmul.mubr.bf16.gmra.mxu0 %v1151_v35 }
 0x107   :  { %v320_v37 = vpop.f32.mrf.mxu0 }
 0x108   :  { %v321_v39 = vadd.f32 %v1354_v36, %v320_v37 }
 0x109   :  { %v949_v38 = vpop.f32.mrf.mxu0 }
 0x10a   :  { %v471_v43 = vmax.f32 %v321_v39, 0.0 }
 0x10b   :  { %v323_v40 = vpop.f32.mrf.mxu0 }
 0x10c   :  { %v324_v41 = vadd.f32 %v1354_v36, %v323_v40 }
 0x10d   :  { %v950_v42 = vpop.f32.mrf.mxu0 }
 0x10e   :  { %v472_v44 = vmax.f32 %v324_v41, 0.0 }
 0x10f   :  { %v328_v45 = vpop.f32.mrf.mxu0 }
 0x110   :  { %v509_v46 = vpack.c.bf16 %v472_v44, %v471_v43  ;;  %v329_v48 = vadd.f32 %v1354_v36, %v328_v45 }
 0x111   :  { %v953_v47 = vpop.f32.mrf.mxu0 }
 0x112   :  { %1040 = vmatmul.mubr.bf16.vlgmr.msra.gmra.mxu1 %v509_v46  ;;  %v473_v52 = vmax.f32 %v329_v48, 0.0 }
 0x113   :  { %v331_v49 = vpop.f32.mrf.mxu0  ;;  %1043 = vmatprep.mubr.msk.bf16.mxu1 %vm1252_vm0, %v1251_v0 }
 0x114   :  { %v332_v50 = vadd.f32 %v1354_v36, %v331_v49 }
 0x115   :  { %v954_v51 = vpop.f32.mrf.mxu0 }
 0x116   :  { %v474_v53 = vmax.f32 %v332_v50, 0.0 }
 0x117   :  { %v336_v54 = vpop.f32.mrf.mxu0 }
 0x118   :  { %v510_v55 = vpack.c.bf16 %v474_v53, %v473_v52  ;;  %v337_v57 = vadd.f32 %v1354_v36, %v336_v54 }
 0x119   :  { %v957_v56 = vpop.f32.mrf.mxu0 }
 0x11a   :  { %1044 = vmatmul.mubr.bf16.gmra.mxu1 %v510_v55  ;;  %v475_v61 = vmax.f32 %v337_v57, 0.0 }
 0x11b   :  { %v339_v58 = vpop.f32.mrf.mxu0  ;;  %1047 = vmatprep.mubr.msk.bf16.mxu1 %vm1252_vm0, %v1251_v0 }
 0x11c   :  { %v340_v59 = vadd.f32 %v1354_v36, %v339_v58 }
 0x11d   :  { %v958_v60 = vpop.f32.mrf.mxu0 }
 0x11e   :  { %v476_v62 = vmax.f32 %v340_v59, 0.0 }
 0x11f   :  { %v344_v63 = vpop.f32.mrf.mxu0 }
 0x120   :  { %v511_v1 = vpack.c.bf16 %v476_v62, %v475_v61  ;;  %v345_v3 = vadd.f32 %v1354_v36, %v344_v63 }
 0x121   :  { %v961_v2 = vpop.f32.mrf.mxu0 }
 0x122   :  { %1048 = vmatmul.mubr.bf16.gmra.mxu1 %v511_v1  ;;  %v477_v7 = vmax.f32 %v345_v3, 0.0 }
 0x123   :  { %v347_v4 = vpop.f32.mrf.mxu0  ;;  %1051 = vmatprep.mubr.msk.bf16.mxu1 %vm1252_vm0, %v1251_v0 }
 0x124   :  { %v348_v5 = vadd.f32 %v1354_v36, %v347_v4 }
 0x125   :  { %v962_v6 = vpop.f32.mrf.mxu0 }
 0x126   :  { %v478_v8 = vmax.f32 %v348_v5, 0.0 }
 0x127   :  { %v352_v9 = vpop.f32.mrf.mxu0 }
 0x128   :  { %v512_v10 = vpack.c.bf16 %v478_v8, %v477_v7  ;;  %v353_v12 = vadd.f32 %v1354_v36, %v352_v9 }
 0x129   :  { %v965_v11 = vpop.f32.mrf.mxu0 }
 0x12a   :  { %1052 = vmatmul.mubr.bf16.gmra.mxu1 %v512_v10  ;;  %v479_v16 = vmax.f32 %v353_v12, 0.0 }
 0x12b   :  { %v355_v13 = vpop.f32.mrf.mxu0  ;;  %1055 = vmatprep.mubr.msk.bf16.mxu1 %vm1252_vm0, %v1251_v0 }
 0x12c   :  { %v356_v14 = vadd.f32 %v1354_v36, %v355_v13 }
 0x12d   :  { %v966_v15 = vpop.f32.mrf.mxu0 }
 0x12e   :  { %v480_v17 = vmax.f32 %v356_v14, 0.0 }
 0x12f   :  { %v360_v18 = vpop.f32.mrf.mxu0 }
 0x130   :  { %v513_v19 = vpack.c.bf16 %v480_v17, %v479_v16  ;;  %v361_v21 = vadd.f32 %v1354_v36, %v360_v18 }
 0x131   :  { %v969_v20 = vpop.f32.mrf.mxu0 }
 0x132   :  { %1056 = vmatmul.mubr.bf16.gmra.mxu1 %v513_v19  ;;  %v481_v25 = vmax.f32 %v361_v21, 0.0 }
 0x133   :  { %v363_v22 = vpop.f32.mrf.mxu0  ;;  %1059 = vmatprep.mubr.msk.bf16.mxu1 %vm1252_vm0, %v1251_v0 }
 0x134   :  { %v364_v23 = vadd.f32 %v1354_v36, %v363_v22 }
 0x135   :  { %v970_v24 = vpop.f32.mrf.mxu0 }
 0x136   :  { %v482_v26 = vmax.f32 %v364_v23, 0.0 }
 0x137   :  { %v368_v27 = vpop.f32.mrf.mxu0 }
 0x138   :  { %v514_v28 = vpack.c.bf16 %v482_v26, %v481_v25  ;;  %v369_v30 = vadd.f32 %v1354_v36, %v368_v27 }
 0x139   :  { %v973_v29 = vpop.f32.mrf.mxu0 }
 0x13a   :  { %1060 = vmatmul.mubr.bf16.gmra.mxu1 %v514_v28  ;;  %v483_v34 = vmax.f32 %v369_v30, 0.0 }
 0x13b   :  { %v371_v31 = vpop.f32.mrf.mxu0  ;;  %1063 = vmatprep.mubr.msk.bf16.mxu1 %vm1252_vm0, %v1251_v0 }
 0x13c   :  { %v372_v32 = vadd.f32 %v1354_v36, %v371_v31 }
 0x13d   :  { %v974_v33 = vpop.f32.mrf.mxu0 }
 0x13e   :  { %v484_v35 = vmax.f32 %v372_v32, 0.0 }
 0x13f   :  { %v376_v37 = vpop.f32.mrf.mxu0 }
 0x140   :  { %v515_v38 = vpack.c.bf16 %v484_v35, %v483_v34  ;;  %v377_v40 = vadd.f32 %v1354_v36, %v376_v37 }
 0x141   :  { %v977_v39 = vpop.f32.mrf.mxu0 }
 0x142   :  { %1064 = vmatmul.mubr.bf16.gmra.mxu1 %v515_v38  ;;  %v485_v44 = vmax.f32 %v377_v40, 0.0 }
 0x143   :  { %v379_v41 = vpop.f32.mrf.mxu0  ;;  %1067 = vmatprep.mubr.msk.bf16.mxu1 %vm1252_vm0, %v1251_v0 }
 0x144   :  { %v380_v42 = vadd.f32 %v1354_v36, %v379_v41 }
 0x145   :  { %v978_v43 = vpop.f32.mrf.mxu0 }
 0x146   :  { %v486_v45 = vmax.f32 %v380_v42, 0.0 }
 0x147   :  { %v384_v46 = vpop.f32.mrf.mxu0 }
 0x148   :  { %v516_v47 = vpack.c.bf16 %v486_v45, %v485_v44  ;;  %v385_v49 = vadd.f32 %v1354_v36, %v384_v46 }
 0x149   :  { %v981_v48 = vpop.f32.mrf.mxu0 }
 0x14a   :  { %1068 = vmatmul.mubr.bf16.gmra.mxu1 %v516_v47  ;;  %v487_v53 = vmax.f32 %v385_v49, 0.0 }
 0x14b   :  { %v387_v50 = vpop.f32.mrf.mxu0  ;;  %1071 = vmatprep.mubr.msk.bf16.mxu1 %vm1252_vm0, %v1251_v0 }
 0x14c   :  { %v388_v51 = vadd.f32 %v1354_v36, %v387_v50 }
 0x14d   :  { %v982_v52 = vpop.f32.mrf.mxu0 }
 0x14e   :  { %v488_v54 = vmax.f32 %v388_v51, 0.0 }
 0x14f   :  { %v392_v55 = vpop.f32.mrf.mxu0 }
 0x150   :  { %v517_v56 = vpack.c.bf16 %v488_v54, %v487_v53  ;;  %v393_v58 = vadd.f32 %v1354_v36, %v392_v55 }
 0x151   :  { %v985_v57 = vpop.f32.mrf.mxu0 }
 0x152   :  { %1072 = vmatmul.mubr.bf16.gmra.mxu1 %v517_v56  ;;  %v489_v62 = vmax.f32 %v393_v58, 0.0 }
 0x153   :  { %v395_v59 = vpop.f32.mrf.mxu0  ;;  %1075 = vmatprep.mubr.msk.bf16.mxu1 %vm1252_vm0, %v1251_v0 }
 0x154   :  { %v396_v60 = vadd.f32 %v1354_v36, %v395_v59 }
 0x155   :  { %v986_v61 = vpop.f32.mrf.mxu0 }
 0x156   :  { %v490_v63 = vmax.f32 %v396_v60, 0.0 }
 0x157   :  { %v400_v1 = vpop.f32.mrf.mxu0 }
 0x158   :  { %v518_v2 = vpack.c.bf16 %v490_v63, %v489_v62  ;;  %v401_v4 = vadd.f32 %v1354_v36, %v400_v1 }
 0x159   :  { %v989_v3 = vpop.f32.mrf.mxu0 }
 0x15a   :  { %1076 = vmatmul.mubr.bf16.gmra.mxu1 %v518_v2  ;;  %v491_v8 = vmax.f32 %v401_v4, 0.0 }
 0x15b   :  { %v403_v5 = vpop.f32.mrf.mxu0  ;;  %1079 = vmatprep.mubr.msk.bf16.mxu1 %vm1252_vm0, %v1251_v0 }
 0x15c   :  { %v404_v6 = vadd.f32 %v1354_v36, %v403_v5 }
 0x15d   :  { %v990_v7 = vpop.f32.mrf.mxu0 }
 0x15e   :  { %v492_v9 = vmax.f32 %v404_v6, 0.0 }
 0x15f   :  { %v408_v10 = vpop.f32.mrf.mxu0 }
 0x160   :  { %v519_v11 = vpack.c.bf16 %v492_v9, %v491_v8  ;;  %v409_v13 = vadd.f32 %v1354_v36, %v408_v10 }
 0x161   :  { %v993_v12 = vpop.f32.mrf.mxu0 }
 0x162   :  { %1080 = vmatmul.mubr.bf16.gmra.mxu1 %v519_v11  ;;  %v493_v17 = vmax.f32 %v409_v13, 0.0 }
 0x163   :  { %v411_v14 = vpop.f32.mrf.mxu0  ;;  %1083 = vmatprep.mubr.msk.bf16.mxu1 %vm1252_vm0, %v1251_v0 }
 0x164   :  { %v412_v15 = vadd.f32 %v1354_v36, %v411_v14 }
 0x165   :  { %v994_v16 = vpop.f32.mrf.mxu0 }
 0x166   :  { %v494_v18 = vmax.f32 %v412_v15, 0.0 }
 0x167   :  { %v416_v19 = vpop.f32.mrf.mxu0 }
 0x168   :  { %v520_v20 = vpack.c.bf16 %v494_v18, %v493_v17  ;;  %v417_v22 = vadd.f32 %v1354_v36, %v416_v19 }
 0x169   :  { %v997_v21 = vpop.f32.mrf.mxu0 }
 0x16a   :  { %1084 = vmatmul.mubr.bf16.gmra.mxu1 %v520_v20  ;;  %v495_v26 = vmax.f32 %v417_v22, 0.0  ;;  %v1433_v21 = vld [vmem:[%s1480_s4] ss:$0 sm:$0xff]  ;;  %s1253_s4 = smov [#allocation8]  }
 0x16b   :  { %v419_v23 = vpop.f32.mrf.mxu0  ;;  %1087 = vmatprep.mubr.msk.bf16.mxu1 %vm1252_vm0, %v1251_v0  ;;  %s827_s10 = sshll.u32 %s1253_s4, 4  ;;  %s828_s10 = int_to_ptr.vmem [resolvable:$true] %s827_s10 }
 0x16c   :  { %v420_v24 = vadd.f32 %v1354_v36, %v419_v23  ;;  %s1220_s11 = scalar_lea.vmem %s828_s10, 4864  ;;  %p1225_p2 = scmp.lt.s32.totalorder %s828_s10, %s828_s10 }
 0x16d   :  { %v998_v25 = vpop.f32.mrf.mxu0  ;;  %p1221_p1 = scmp.ne.s32.totalorder %s828_s10, %s1220_s11  ;;  %p1226_p3 = scmp.lt.s32.totalorder %s1220_s11, %s1220_s11 }
 0x16e   :  { %v496_v27 = vmax.f32 %v420_v24, 0.0 }
 0x16f   :  { %v424_v28 = vpop.f32.mrf.mxu0  ;;  %p1227_p4 = por %p1226_p3, %p1225_p2 }
 0x170   :  { %v521_v29 = vpack.c.bf16 %v496_v27, %v495_v26  ;;  %v425_v31 = vadd.f32 %v1354_v36, %v424_v28 }
 0x171   :  { %v1001_v30 = vpop.f32.mrf.mxu0  ;;  %p1228_p5 = pnand %p1227_p4, %p1221_p1 }
 0x172   :  { %1088 = vmatmul.mubr.bf16.gmra.mxu1 %v521_v29  ;;  %v497_v35 = vmax.f32 %v425_v31, 0.0 }
 0x173   :  { %v427_v32 = vpop.f32.mrf.mxu0  ;;  %1091 = vmatprep.mubr.msk.bf16.mxu1 %vm1252_vm0, %v1251_v0 }
 0x174   :  { %v428_v33 = vadd.f32 %v1354_v36, %v427_v32 }
 0x175   :  { %v1002_v34 = vpop.f32.mrf.mxu0 }
 0x176   :  { %v498_v37 = vmax.f32 %v428_v33, 0.0 }
 0x177   :  { %v432_v38 = vpop.f32.mrf.mxu0 }
 0x178   :  { %v522_v39 = vpack.c.bf16 %v498_v37, %v497_v35  ;;  %v433_v41 = vadd.f32 %v1354_v36, %v432_v38 }
 0x179   :  { %v1005_v40 = vpop.f32.mrf.mxu0 }
 0x17a   :  { %1092 = vmatmul.mubr.bf16.gmra.mxu1 %v522_v39  ;;  %v499_v45 = vmax.f32 %v433_v41, 0.0 }
 0x17b   :  { %v435_v42 = vpop.f32.mrf.mxu0  ;;  %1095 = vmatprep.mubr.msk.bf16.mxu1 %vm1252_vm0, %v1251_v0 }
 0x17c   :  { %v436_v43 = vadd.f32 %v1354_v36, %v435_v42 }
 0x17d   :  { %v1006_v44 = vpop.f32.mrf.mxu0 }
 0x17e   :  { %v500_v46 = vmax.f32 %v436_v43, 0.0 }
 0x17f   :  { %v440_v47 = vpop.f32.mrf.mxu0 }
 0x180   :  { %v523_v48 = vpack.c.bf16 %v500_v46, %v499_v45  ;;  %v441_v50 = vadd.f32 %v1354_v36, %v440_v47 }
 0x181   :  { %v1009_v49 = vpop.f32.mrf.mxu0 }
 0x182   :  { %1096 = vmatmul.mubr.bf16.gmra.mxu1 %v523_v48  ;;  %v501_v54 = vmax.f32 %v441_v50, 0.0 }
 0x183   :  { %v443_v51 = vpop.f32.mrf.mxu0  ;;  %1099 = vmatprep.mubr.msk.bf16.mxu1 %vm1252_vm0, %v1251_v0 }
 0x184   :  { %v444_v52 = vadd.f32 %v1354_v36, %v443_v51 }
 0x185   :  { %v1010_v53 = vpop.f32.mrf.mxu0 }
 0x186   :  { %v502_v55 = vmax.f32 %v444_v52, 0.0 }
 0x187   :  { %v448_v56 = vpop.f32.mrf.mxu0 }
 0x188   :  { %v524_v57 = vpack.c.bf16 %v502_v55, %v501_v54  ;;  %v449_v59 = vadd.f32 %v1354_v36, %v448_v56 }
 0x189   :  { %v1013_v58 = vpop.f32.mrf.mxu0 }
 0x18a   :  { %1100 = vmatmul.mubr.bf16.gmra.mxu1 %v524_v57  ;;  %v503_v63 = vmax.f32 %v449_v59, 0.0 }
 0x18b   :  { %v451_v60 = vpop.f32.mrf.mxu0  ;;  %1103 = vmatprep.mubr.msk.bf16.mxu1 %vm1252_vm0, %v1251_v0 }
 0x18c   :  { %v452_v61 = vadd.f32 %v1354_v36, %v451_v60 }
 0x18d   :  { %v1014_v62 = vpop.f32.mrf.mxu0 }
 0x18e   :  { %v504_v1 = vmax.f32 %v452_v61, 0.0 }
 0x18f   :  { %v456_v2 = vpop.f32.mrf.mxu0 }
 0x190   :  { %v525_v3 = vpack.c.bf16 %v504_v1, %v503_v63  ;;  %v457_v5 = vadd.f32 %v1354_v36, %v456_v2 }
 0x191   :  { %v1017_v4 = vpop.f32.mrf.mxu0 }
 0x192   :  { %1104 = vmatmul.mubr.bf16.gmra.mxu1 %v525_v3  ;;  %v505_v9 = vmax.f32 %v457_v5, 0.0 }
 0x193   :  { %v459_v6 = vpop.f32.mrf.mxu0  ;;  %1107 = vmatprep.mubr.msk.bf16.mxu1 %vm1252_vm0, %v1251_v0 }
 0x194   :  { %v460_v7 = vadd.f32 %v1354_v36, %v459_v6 }
 0x195   :  { %v1018_v8 = vpop.f32.mrf.mxu0 }
 0x196   :  { %v506_v10 = vmax.f32 %v460_v7, 0.0 }
 0x197   :  { %v464_v11 = vpop.f32.mrf.mxu0 }
 0x198   :  { %v526_v12 = vpack.c.bf16 %v506_v10, %v505_v9  ;;  %v465_v14 = vadd.f32 %v1354_v36, %v464_v11 }
 0x199   :  { %v1021_v13 = vpop.f32.mrf.mxu0 }
 0x19a   :  { %1108 = vmatmul.mubr.bf16.gmra.mxu1 %v526_v12  ;;  %v507_v18 = vmax.f32 %v465_v14, 0.0 }
 0x19b   :  { %v467_v15 = vpop.f32.mrf.mxu0  ;;  %1111 = vmatprep.mubr.msk.bf16.mxu1 %vm1252_vm0, %v1251_v0 }
 0x19c   :  { %v468_v16 = vadd.f32 %v1354_v36, %v467_v15 }
 0x19d   :  { %v1022_v17 = vpop.f32.mrf.mxu0 }
 0x19e   :  { %v508_v19 = vmax.f32 %v468_v16, 0.0 }
 0x1a0   :  { %v527_v20 = vpack.c.bf16 %v508_v19, %v507_v18 }
 0x1a2   :  { %1112 = vmatmul.mubr.bf16.gmra.mxu1 %v527_v20 }
 0x1d2   :  { %v633_v22 = vpop.f32.mrf.mxu1 }
 0x1d3   :  { %v634_v23 = vadd.f32 %v1433_v21, %v633_v22 }
 0x1d4   :  { %v1041_v24 = vpop.f32.mrf.mxu1 }
 0x1d5   :  { %784 = vst [vmem:[#allocation8] sm:$0xff] %v634_v23 }
 0x1d6   :  { %v636_v25 = vpop.f32.mrf.mxu1 }
 0x1d7   :  { %v637_v0 = vadd.f32 %v1433_v21, %v636_v25 }
 0x1d8   :  { %v1042_v26 = vpop.f32.mrf.mxu1 }
 0x1d9   :  { %785 = vst [vmem:[#allocation8 + $0x8] sm:$0xff] %v637_v0 }
 0x1da   :  { %v641_v36 = vpop.f32.mrf.mxu1 }
 0x1db   :  { %v642_v27 = vadd.f32 %v1433_v21, %v641_v36 }
 0x1dc   :  { %v1045_v28 = vpop.f32.mrf.mxu1 }
 0x1dd   :  { %786 = vst [vmem:[#allocation8 + $0x10] sm:$0xff] %v642_v27 }
 0x1de   :  { %v644_v29 = vpop.f32.mrf.mxu1 }
 0x1df   :  { %v645_v30 = vadd.f32 %v1433_v21, %v644_v29 }
 0x1e0   :  { %v1046_v31 = vpop.f32.mrf.mxu1 }
 0x1e1   :  { %787 = vst [vmem:[#allocation8 + $0x18] sm:$0xff] %v645_v30 }
 0x1e2   :  { %v649_v32 = vpop.f32.mrf.mxu1 }
 0x1e3   :  { %v650_v33 = vadd.f32 %v1433_v21, %v649_v32 }
 0x1e4   :  { %v1049_v34 = vpop.f32.mrf.mxu1 }
 0x1e5   :  { %788 = vst [vmem:[#allocation8 + $0x20] sm:$0xff] %v650_v33 }
 0x1e6   :  { %v652_v35 = vpop.f32.mrf.mxu1 }
 0x1e7   :  { %v653_v37 = vadd.f32 %v1433_v21, %v652_v35 }
 0x1e8   :  { %v1050_v38 = vpop.f32.mrf.mxu1 }
 0x1e9   :  { %789 = vst [vmem:[#allocation8 + $0x28] sm:$0xff] %v653_v37 }
 0x1ea   :  { %v657_v39 = vpop.f32.mrf.mxu1 }
 0x1eb   :  { %v658_v40 = vadd.f32 %v1433_v21, %v657_v39 }
 0x1ec   :  { %v1053_v41 = vpop.f32.mrf.mxu1 }
 0x1ed   :  { %790 = vst [vmem:[#allocation8 + $0x30] sm:$0xff] %v658_v40 }
 0x1ee   :  { %v660_v42 = vpop.f32.mrf.mxu1 }
 0x1ef   :  { %v661_v43 = vadd.f32 %v1433_v21, %v660_v42 }
 0x1f0   :  { %v1054_v44 = vpop.f32.mrf.mxu1 }
 0x1f1   :  { %791 = vst [vmem:[#allocation8 + $0x38] sm:$0xff] %v661_v43 }
 0x1f2   :  { %v665_v45 = vpop.f32.mrf.mxu1 }
 0x1f3   :  { %v666_v46 = vadd.f32 %v1433_v21, %v665_v45 }
 0x1f4   :  { %v1057_v47 = vpop.f32.mrf.mxu1 }
 0x1f5   :  { %792 = vst [vmem:[#allocation8 + $0x40] sm:$0xff] %v666_v46 }
 0x1f6   :  { %v668_v48 = vpop.f32.mrf.mxu1 }
 0x1f7   :  { %v669_v49 = vadd.f32 %v1433_v21, %v668_v48 }
 0x1f8   :  { %v1058_v50 = vpop.f32.mrf.mxu1 }
 0x1f9   :  { %793 = vst [vmem:[#allocation8 + $0x48] sm:$0xff] %v669_v49 }
 0x1fa   :  { %v673_v51 = vpop.f32.mrf.mxu1 }
 0x1fb   :  { %v674_v52 = vadd.f32 %v1433_v21, %v673_v51 }
 0x1fc   :  { %v1061_v53 = vpop.f32.mrf.mxu1 }
 0x1fd   :  { %794 = vst [vmem:[#allocation8 + $0x50] sm:$0xff] %v674_v52 }
 0x1fe   :  { %v676_v54 = vpop.f32.mrf.mxu1 }
 0x1ff   :  { %v677_v55 = vadd.f32 %v1433_v21, %v676_v54 }
 0x200   :  { %v1062_v56 = vpop.f32.mrf.mxu1 }
 0x201   :  { %795 = vst [vmem:[#allocation8 + $0x58] sm:$0xff] %v677_v55 }
 0x202   :  { %v681_v57 = vpop.f32.mrf.mxu1 }
 0x203   :  { %v682_v58 = vadd.f32 %v1433_v21, %v681_v57 }
 0x204   :  { %v1065_v59 = vpop.f32.mrf.mxu1 }
 0x205   :  { %796 = vst [vmem:[#allocation8 + $0x60] sm:$0xff] %v682_v58 }
 0x206   :  { %v684_v60 = vpop.f32.mrf.mxu1 }
 0x207   :  { %v685_v61 = vadd.f32 %v1433_v21, %v684_v60 }
 0x208   :  { %v1066_v62 = vpop.f32.mrf.mxu1 }
 0x209   :  { %797 = vst [vmem:[#allocation8 + $0x68] sm:$0xff] %v685_v61 }
 0x20a   :  { %v689_v63 = vpop.f32.mrf.mxu1 }
 0x20b   :  { %v690_v1 = vadd.f32 %v1433_v21, %v689_v63 }
 0x20c   :  { %v1069_v2 = vpop.f32.mrf.mxu1 }
 0x20d   :  { %798 = vst [vmem:[#allocation8 + $0x70] sm:$0xff] %v690_v1 }
 0x20e   :  { %v692_v3 = vpop.f32.mrf.mxu1 }
 0x20f   :  { %v693_v4 = vadd.f32 %v1433_v21, %v692_v3 }
 0x210   :  { %v1070_v5 = vpop.f32.mrf.mxu1 }
 0x211   :  { %799 = vst [vmem:[#allocation8 + $0x78] sm:$0xff] %v693_v4 }
 0x212   :  { %v697_v6 = vpop.f32.mrf.mxu1 }
 0x213   :  { %v698_v7 = vadd.f32 %v1433_v21, %v697_v6 }
 0x214   :  { %v1073_v8 = vpop.f32.mrf.mxu1 }
 0x215   :  { %800 = vst [vmem:[#allocation8 + $0x80] sm:$0xff] %v698_v7 }
 0x216   :  { %v700_v9 = vpop.f32.mrf.mxu1 }
 0x217   :  { %v701_v10 = vadd.f32 %v1433_v21, %v700_v9 }
 0x218   :  { %v1074_v11 = vpop.f32.mrf.mxu1 }
 0x219   :  { %801 = vst [vmem:[#allocation8 + $0x88] sm:$0xff] %v701_v10 }
 0x21a   :  { %v705_v12 = vpop.f32.mrf.mxu1 }
 0x21b   :  { %v706_v13 = vadd.f32 %v1433_v21, %v705_v12 }
 0x21c   :  { %v1077_v14 = vpop.f32.mrf.mxu1 }
 0x21d   :  { %802 = vst [vmem:[#allocation8 + $0x90] sm:$0xff] %v706_v13 }
 0x21e   :  { %v708_v15 = vpop.f32.mrf.mxu1 }
 0x21f   :  { %v709_v16 = vadd.f32 %v1433_v21, %v708_v15 }
 0x220   :  { %v1078_v17 = vpop.f32.mrf.mxu1 }
 0x221   :  { %803 = vst [vmem:[#allocation8 + $0x98] sm:$0xff] %v709_v16 }
 0x222   :  { %v713_v18 = vpop.f32.mrf.mxu1 }
 0x223   :  { %v714_v19 = vadd.f32 %v1433_v21, %v713_v18 }
 0x224   :  { %v1081_v20 = vpop.f32.mrf.mxu1 }
 0x225   :  { %804 = vst [vmem:[#allocation8 + $0xa0] sm:$0xff] %v714_v19 }
 0x226   :  { %v716_v22 = vpop.f32.mrf.mxu1 }
 0x227   :  { %v717_v23 = vadd.f32 %v1433_v21, %v716_v22 }
 0x228   :  { %v1082_v24 = vpop.f32.mrf.mxu1 }
 0x229   :  { %805 = vst [vmem:[#allocation8 + $0xa8] sm:$0xff] %v717_v23 }
 0x22a   :  { %v721_v25 = vpop.f32.mrf.mxu1 }
 0x22b   :  { %v722_v0 = vadd.f32 %v1433_v21, %v721_v25 }
 0x22c   :  { %v1085_v26 = vpop.f32.mrf.mxu1 }
 0x22d   :  { %806 = vst [vmem:[#allocation8 + $0xb0] sm:$0xff] %v722_v0 }
 0x22e   :  { %v724_v36 = vpop.f32.mrf.mxu1 }
 0x22f   :  { %v725_v27 = vadd.f32 %v1433_v21, %v724_v36 }
 0x230   :  { %v1086_v28 = vpop.f32.mrf.mxu1 }
 0x231   :  { %807 = vst [vmem:[#allocation8 + $0xb8] sm:$0xff] %v725_v27 }
 0x232   :  { %v729_v29 = vpop.f32.mrf.mxu1 }
 0x233   :  { %v730_v30 = vadd.f32 %v1433_v21, %v729_v29 }
 0x234   :  { %v1089_v31 = vpop.f32.mrf.mxu1 }
 0x235   :  { %808 = vst [vmem:[#allocation8 + $0xc0] sm:$0xff] %v730_v30 }
 0x236   :  { %v732_v32 = vpop.f32.mrf.mxu1 }
 0x237   :  { %v733_v33 = vadd.f32 %v1433_v21, %v732_v32 }
 0x238   :  { %v1090_v34 = vpop.f32.mrf.mxu1 }
 0x239   :  { %809 = vst [vmem:[#allocation8 + $0xc8] sm:$0xff] %v733_v33 }
 0x23a   :  { %v737_v35 = vpop.f32.mrf.mxu1 }
 0x23b   :  { %v738_v37 = vadd.f32 %v1433_v21, %v737_v35 }
 0x23c   :  { %v1093_v38 = vpop.f32.mrf.mxu1 }
 0x23d   :  { %810 = vst [vmem:[#allocation8 + $0xd0] sm:$0xff] %v738_v37 }
 0x23e   :  { %v740_v39 = vpop.f32.mrf.mxu1 }
 0x23f   :  { %v741_v40 = vadd.f32 %v1433_v21, %v740_v39 }
 0x240   :  { %v1094_v41 = vpop.f32.mrf.mxu1 }
 0x241   :  { %811 = vst [vmem:[#allocation8 + $0xd8] sm:$0xff] %v741_v40 }
 0x242   :  { %v745_v42 = vpop.f32.mrf.mxu1 }
 0x243   :  { %v746_v43 = vadd.f32 %v1433_v21, %v745_v42 }
 0x244   :  { %v1097_v44 = vpop.f32.mrf.mxu1 }
 0x245   :  { %812 = vst [vmem:[#allocation8 + $0xe0] sm:$0xff] %v746_v43 }
 0x246   :  { %v748_v45 = vpop.f32.mrf.mxu1 }
 0x247   :  { %v749_v46 = vadd.f32 %v1433_v21, %v748_v45 }
 0x248   :  { %v1098_v47 = vpop.f32.mrf.mxu1 }
 0x249   :  { %813 = vst [vmem:[#allocation8 + $0xe8] sm:$0xff] %v749_v46 }
 0x24a   :  { %v753_v48 = vpop.f32.mrf.mxu1 }
 0x24b   :  { %v754_v49 = vadd.f32 %v1433_v21, %v753_v48 }
 0x24c   :  { %v1101_v50 = vpop.f32.mrf.mxu1 }
 0x24d   :  { %814 = vst [vmem:[#allocation8 + $0xf0] sm:$0xff] %v754_v49 }
 0x24e   :  { %v756_v51 = vpop.f32.mrf.mxu1 }
 0x24f   :  { %v757_v52 = vadd.f32 %v1433_v21, %v756_v51 }
 0x250   :  { %v1102_v53 = vpop.f32.mrf.mxu1 }
 0x251   :  { %815 = vst [vmem:[#allocation8 + $0xf8] sm:$0xff] %v757_v52 }
 0x252   :  { %v761_v54 = vpop.f32.mrf.mxu1 }
 0x253   :  { %v762_v55 = vadd.f32 %v1433_v21, %v761_v54 }
 0x254   :  { %v1105_v56 = vpop.f32.mrf.mxu1 }
 0x255   :  { %816 = vst [vmem:[#allocation8 + $0x100] sm:$0xff] %v762_v55 }
 0x256   :  { %v764_v57 = vpop.f32.mrf.mxu1 }
 0x257   :  { %v765_v58 = vadd.f32 %v1433_v21, %v764_v57 }
 0x258   :  { %v1106_v59 = vpop.f32.mrf.mxu1 }
 0x259   :  { %817 = vst [vmem:[#allocation8 + $0x108] sm:$0xff] %v765_v58 }
 0x25a   :  { %v769_v60 = vpop.f32.mrf.mxu1 }
 0x25b   :  { %v770_v61 = vadd.f32 %v1433_v21, %v769_v60 }
 0x25c   :  { %v1109_v62 = vpop.f32.mrf.mxu1 }
 0x25d   :  { %818 = vst [vmem:[#allocation8 + $0x110] sm:$0xff] %v770_v61 }
 0x25e   :  { %v772_v63 = vpop.f32.mrf.mxu1 }
 0x25f   :  { %v773_v1 = vadd.f32 %v1433_v21, %v772_v63 }
 0x260   :  { %v1110_v2 = vpop.f32.mrf.mxu1 }
 0x261   :  { %819 = vst [vmem:[#allocation8 + $0x118] sm:$0xff] %v773_v1 }
 0x262   :  { %v777_v3 = vpop.f32.mrf.mxu1 }
 0x263   :  { %v778_v4 = vadd.f32 %v1433_v21, %v777_v3 }
 0x264   :  { %v1113_v5 = vpop.f32.mrf.mxu1 }
 0x265   :  { %820 = vst [vmem:[#allocation8 + $0x120] sm:$0xff] %v778_v4 }
 0x266   :  { %v780_v6 = vpop.f32.mrf.mxu1 }
 0x267   :  { %v781_v7 = vadd.f32 %v1433_v21, %v780_v6 }
 0x268   :  { %v1114_v8 = vpop.f32.mrf.mxu1 }
 0x269   :  { %821 = vst [vmem:[#allocation8 + $0x128] sm:$0xff] %v781_v7 }
 0x26a   :  { %1231 = shalt.err (!%p1228_p5)
}
 0x26b   :  { %s1254_s12 = smov 128   ;;  %s1255_s13 = smov 8  }
 0x26c   :  { %833 = dma.vmem_to_hbm [thread:$0]  %s828_s10, 4864, %s1481_s5, [#allocation4], %s1254_s12, %s1254_s12, %s1255_s13  }
 0x26d   :  { %1244 = dma.done.wait [#allocation4], 4864  }
 0x26e   :  { %1245 = vsyncadd [#allocation4], 4294962432 }
 0x26f   :  { %837 = vsyncpa [#allocation3], 1 }
 0x270   :  { %838 = vsyncpa [#allocation6], 1 }
 0x271   :  { %839 = vsyncpa [#allocation4], 1 }

</bundles_post_ra>
